<compile_context>
chip_gen: v6e
topology: v6e:2x2x1
jax: 0.10.0
libtpu: 0.0.40
codegen_flags: <defaults>
</compile_context>

<pallas_src>
import jax
import jax.numpy as jnp
from jax import lax
from jax.experimental import pallas as pl
from jax.experimental.pallas import tpu as pltpu

ker_width = 3  # matches the PyTorch module


def _open_layer_kernel(p_ref, w_ref, b_ref, o_ref):
    # p_ref: [Bblk, K, HW]   bf16 im2col patches (K = 9*Cin, rows ordered (ci,kh,kw))
    # w_ref: [Cout, K]       bf16 conv weights (VMEM-resident across grid steps)
    # b_ref: [Cout, 1]       f32 bias (VMEM-resident)
    # o_ref: [Bblk, Cout, HW] f32 output, lane-dense along HW
    w = w_ref[...]
    b = b_ref[...]
    bblk = p_ref.shape[0]
    # bblk is a compile-time block size (1 at the toy shapes): static unroll.
    for i in range(bblk):
        # Single fused MXU matmul per image: [Cout, K] @ [K, HW], f32 accumulate.
        acc = jnp.dot(w, p_ref[i], preferred_element_type=jnp.float32)
        # f32 bias broadcast + ReLU epilogue, dense (unmasked) store.
        o_ref[i] = jnp.maximum(acc + b, 0.0).astype(o_ref.dtype)


def _pick_batch_block(n, in_bytes_per_image, out_bytes_per_image,
                      target_bytes=2 << 20):
    """Biggest per-step batch block with ~target_bytes of input+output, that
    divides N and (when possible) leaves >= 2 grid steps for v7x's 2 cores."""
    per_image = in_bytes_per_image + out_bytes_per_image
    bblk = max(1, min(n, target_bytes // max(per_image, 1)))
    while bblk > 1 and (n % bblk != 0 or n // bblk < 2):
        bblk -= 1
    return int(bblk)


def open_layer_forward(x_nchw, weight, bias):
    """x_nchw: [N, Cin, H, W] f32; weight: [Cout, Cin, 3, 3] (PyTorch OIHW); bias: [Cout]."""
    n, cin, h, w = x_nchw.shape
    cout = weight.shape[0]
    k = cin * ker_width * ker_width
    hw = h * w

    # im2col in one fused XLA op (padding=1 folded in; no explicit pad+transpose
    # HBM round trips). Feature dim is ordered (ci, kh, kw) with ci slowest,
    # which matches a plain OIHW flatten of the weight.
    patches = lax.conv_general_dilated_patches(
        x_nchw.astype(jnp.bfloat16),
        filter_shape=(ker_width, ker_width),
        window_strides=(1, 1),
        padding=((1, 1), (1, 1)),
        dimension_numbers=("NCHW", "OIHW", "NCHW"),
    )                                   # [N, 9*Cin, H, W] bf16
    patches = patches.reshape(n, k, hw)  # free reshape (contiguous)

    w_mat = weight.reshape(cout, k).astype(jnp.bfloat16)   # [Cout, 9*Cin]
    b_col = bias.reshape(cout, 1).astype(jnp.float32)      # [Cout, 1], f32 epilogue

    bblk = _pick_batch_block(n,
                             in_bytes_per_image=k * hw * 2,
                             out_bytes_per_image=cout * hw * 4)
    grid = (n // bblk,)

    flops = 2 * n * hw * cout * k
    bytes_accessed = (patches.size * 2 + w_mat.size * 2
                      + b_col.size * 4 + n * cout * hw * 4)

    out = pl.pallas_call(
        _open_layer_kernel,
        out_shape=jax.ShapeDtypeStruct((n, cout, hw), x_nchw.dtype),
        grid=grid,
        in_specs=[
            pl.BlockSpec((bblk, k, hw), lambda b: (b, 0, 0)),   # pipelined patches DMA
            pl.BlockSpec((cout, k), lambda b: (0, 0)),          # resident weights
            pl.BlockSpec((cout, 1), lambda b: (0, 0)),          # resident bias
        ],
        out_specs=pl.BlockSpec((bblk, cout, hw), lambda b: (b, 0, 0)),
        compiler_params=pltpu.CompilerParams(
            dimension_semantics=("parallel",),   # v7x: shard batch over 2 TCs
            vmem_limit_bytes=32 << 20,           # safe on v5e (128M) / v6e (128M) / v7x (64M)
        ),
        cost_estimate=pl.CostEstimate(
            flops=flops, transcendentals=0, bytes_accessed=bytes_accessed),
    )(patches, w_mat, b_col)

    # [N, Cout, H*W] -> [N, Cout, H, W]: pure reshape, layout already NCHW.
    return out.reshape(n, cout, h, w)


if __name__ == "__main__":
    key = jax.random.PRNGKey(0)
    k_x, k_w, k_b = jax.random.split(key, 3)

    batch, in_channels, channels, spatial = 2, 3, 4, 16
    fan_in = in_channels * ker_width * ker_width  # 27

    # Deterministic "PyTorch-style" Conv2d init: U(-1/sqrt(fan_in), 1/sqrt(fan_in)).
    bound = 1.0 / jnp.sqrt(jnp.float32(fan_in))
    weight = jax.random.uniform(
        k_w, (channels, in_channels, ker_width, ker_width), jnp.float32, -bound, bound)
    bias = jax.random.uniform(k_b, (channels,), jnp.float32, -bound, bound)
    x = jax.random.normal(
        k_x, (batch, in_channels, spatial, spatial), jnp.float32)

    out = jax.block_until_ready(open_layer_forward(x, weight, bias))

    # Reference: plain XLA conv + bias + ReLU (same math as F.relu(nn.Conv2d(...)(x))).
    ref = jax.lax.conv_general_dilated(
        x, weight, window_strides=(1, 1), padding=((1, 1), (1, 1)),
        dimension_numbers=("NCHW", "OIHW", "NCHW"),
        precision=jax.lax.Precision.HIGHEST)
    ref = jnp.maximum(ref + bias.reshape(1, channels, 1, 1), 0.0)

    assert out.shape == (batch, channels, spatial, spatial)
    # bf16 matmul operands (f32 accumulation) vs an f32 HIGHEST-precision reference.
    assert jnp.allclose(out, ref, atol=2e-2, rtol=2e-2)

    print("KERNEL_OK")
</pallas_src>

<mosaic_0001>
module attributes {stable_mosaic.version = 11 : i64} {
  func.func @_open_layer_kernel(%arg0: i32, %arg1: memref<1x27x256xbf16, #tpu.memory_space<vmem>>, %arg2: memref<4x27xbf16, #tpu.memory_space<vmem>>, %arg3: memref<4x1xf32, #tpu.memory_space<vmem>>, %arg4: memref<1x4x256xf32, #tpu.memory_space<vmem>>) attributes {dimension_semantics = [#tpu.dimension_semantics<parallel>], iteration_bounds = array<i64: 2>, scalar_prefetch = 0 : i64, scratch_operands = 0 : i64, tpu.core_type = #tpu.core_type<tc>, window_params = [{transform_indices = @transform_0, window_bounds = array<i64: 1, 27, 256>}, {pipeline_mode = #tpu.pipeline_mode<synchronous>, transform_indices = @transform_1, window_bounds = array<i64: 4, 27>}, {pipeline_mode = #tpu.pipeline_mode<synchronous>, transform_indices = @transform_2, window_bounds = array<i64: 4, 1>}, {transform_indices = @transform_3, window_bounds = array<i64: 1, 4, 256>}]} {
    %c0 = arith.constant 0 : index
    %c0_0 = arith.constant 0 : index
    %0 = vector.load %arg2[%c0, %c0_0] : memref<4x27xbf16, #tpu.memory_space<vmem>>, vector<4x27xbf16>
    %c0_1 = arith.constant 0 : index
    %c0_2 = arith.constant 0 : index
    %1 = vector.load %arg3[%c0_1, %c0_2] : memref<4x1xf32, #tpu.memory_space<vmem>>, vector<4x1xf32>
    %c0_3 = arith.constant 0 : index
    %c0_4 = arith.constant 0 : index
    %c0_5 = arith.constant 0 : index
    %2 = vector.load %arg1[%c0_3, %c0_4, %c0_5] : memref<1x27x256xbf16, #tpu.memory_space<vmem>>, vector<1x27x256xbf16>
    %3 = vector.shape_cast %2 : vector<1x27x256xbf16> to vector<27x256xbf16>
    %cst = arith.constant dense<0.000000e+00> : vector<4x256xf32>
    %4 = tpu.matmul %0, %3, %cst {dimension_numbers = #tpu.dot_dimension_numbers<[1], [0], [0], [1], [0, 0, 1, 1], [], []>} : vector<4x27xbf16>, vector<27x256xbf16>, vector<4x256xf32> -> vector<4x256xf32>
    %5 = vector.broadcast %1 : vector<4x1xf32> to vector<4x256xf32>
    %6 = arith.addf %4, %5 : vector<4x256xf32>
    %cst_6 = arith.constant 0.000000e+00 : f32
    %7 = vector.broadcast %cst_6 : f32 to vector<4x256xf32>
    %8 = arith.maximumf %6, %7 : vector<4x256xf32>
    %c0_7 = arith.constant 0 : index
    %c0_8 = arith.constant 0 : index
    %c0_9 = arith.constant 0 : index
    %9 = vector.load %arg4[%c0_7, %c0_8, %c0_9] : memref<1x4x256xf32, #tpu.memory_space<vmem>>, vector<1x4x256xf32>
    %10 = vector.shape_cast %9 : vector<1x4x256xf32> to vector<4x256xf32>
    %11 = vector.shape_cast %8 : vector<4x256xf32> to vector<1x4x256xf32>
    tpu.vector_store %arg4[%c0_7, %c0_8, %c0_9], %11 {strides = array<i32>} : memref<1x4x256xf32, #tpu.memory_space<vmem>>, vector<1x4x256xf32>,
    return
  }
  func.func @transform_0(%arg0: i32) -> (i32, i32, i32) {
    %c0_i32 = arith.constant 0 : i32
    %c0_i32_0 = arith.constant 0 : i32
    %c0_i32_1 = arith.constant 0 : i32
    return %arg0, %c0_i32, %c0_i32_0 : i32, i32, i32
  }
  func.func @transform_1(%arg0: i32) -> (i32, i32) {
    %c0_i32 = arith.constant 0 : i32
    %c0_i32_0 = arith.constant 0 : i32
    %c0_i32_1 = arith.constant 0 : i32
    return %c0_i32, %c0_i32_0 : i32, i32
  }
  func.func @transform_2(%arg0: i32) -> (i32, i32) {
    %c0_i32 = arith.constant 0 : i32
    %c0_i32_0 = arith.constant 0 : i32
    %c0_i32_1 = arith.constant 0 : i32
    return %c0_i32, %c0_i32_0 : i32, i32
  }
  func.func @transform_3(%arg0: i32) -> (i32, i32, i32) {
    %c0_i32 = arith.constant 0 : i32
    %c0_i32_0 = arith.constant 0 : i32
    %c0_i32_1 = arith.constant 0 : i32
    return %arg0, %c0_i32, %c0_i32_0 : i32, i32, i32
  }
}

</mosaic_0001>

<bundles_post_ra>
// kernel: tpu_custom_call.1
= control target key start
LH: loop header
LB: loop body
LE: loop exit
PB: predicated region body
PF: predicated region fallthrough
CT: control target
= control target key end

     0   :  { %8 = vsyncpa [#allocation3], 0  ;;  %s580_s0 = inlined_call_operand.vmem [shape: bf16[2,27,256], index: 0, kind: input, shape index: {}]   ;;  %s581_s1 = inlined_call_operand.vmem [shape: bf16[4,27], index: 1, kind: input, shape index: {}]   ;;  %s582_s2 = inlined_call_operand.vmem [shape: f32[4,1], index: 2, kind: input, shape index: {}]   ;;  %s583_s3 = inlined_call_operand.hbm [shape: f32[2,4,256], index: 3, kind: output, shape index: {}]  }
   0x1   :  { %10 = vsyncpa [#allocation3 + $0x1], 0  ;;  %s487_s12 = smov 0   ;;  %s489_s13 = smov 0  }
   0x2   :  { %s491_s14 = smov 0   ;;  %s493_s15 = smov 0  }
   0x3 LB: > { %s508_s16 = sadd.s32 4294967295, %s462_s15   ;;  %s335_s17 = sadd.s32 4294967294, %s462_s15   ;;  %s462_s15 = sphi %s493_s15, %s589_s15   ;;  %s458_s14 = sphi %s491_s14, %s588_s14   ;;  %s454_s13 = sphi %s489_s13, %s587_s13   ;;  %s450_s12 = sphi %s487_s12, %s586_s12  }
   0x4   : > { %s512_s18 = sadd.s32 1, %s462_s15   ;;  %s91_s19 = sadd.s32 1, %s458_s14 }
   0x5   : > { %s88_s20 = ssub.s32 %s462_s15, %s512_s18  ;;  %p101_p0 = scmp.ne.s32.totalorder %s458_s14, %s454_s13 }
   0x6   : > { %p89_p1 = scmp.eq.s32.totalorder %s88_s20, 0  ;;  %p102_p2 = scmp.eq.s32.totalorder %s508_s16, 1 }
   0x7   : > { %p107_p3 = scmp.ne.s32.totalorder %s454_s13, %s450_s12  ;;  %p108_p4 = scmp.eq.s32.totalorder %s335_s17, 1 }
   0x8   : > { %s523_s21 = scalar_select %p89_p1, %s458_s14, %s91_s19  }
   0x9   : > { %p525_p5 = por %p102_p2, %p101_p0  ;;  %p529_p6 = por %p108_p4, %p107_p3 }
   0xa   : > { %p338_p7 = scmp.ge.s32.totalorder %s462_s15, 1  ;;  %p140_p8 = scmp.lt.s32.totalorder %s462_s15, 3 }
   0xc   : > { %p141_p9 = pnand %p338_p7, %p140_p8 }
   0xd   : > { %p164_p10 = scmp.lt.s32.totalorder (!%p141_p9), %s508_s16, 1  ;;  %s161_s6 = sand.u32 (!%p141_p9), 1, %s454_s13  }
   0xe   : > { %144 = sbr.rel (%p141_p9) target bundleno = 248 (0xf8), region = 32  ;;  %s339_s7 = sshll.u32 (!%p141_p9), %s161_s6, 3 }
   0xf   : > { %s353_s8 = sshll.u32 (!%p141_p9), %s508_s16, 7  ;;  %s163_s9 = scalar_lea.vmem (!%p141_p9), [#allocation2], %s339_s7 }
  0x10   : > { %s276_s10 = sshll.u32 (!%p141_p9), %s163_s9, 4  ;;  %s274_s19 = scalar_lea.hbm (!%p141_p9), %s583_s3, %s353_s8  ;;  %s277_s10 = int_to_ptr.vmem [resolvable:$true] %s276_s10 }
  0x11   : > { %s262_s20 = scalar_lea.sflag (!%p141_p9), [#allocation3], %s161_s6  ;;  %s402_s24 = scalar_lea.vmem (!%p141_p9), %s277_s10, 128 }
  0x12   : > { %p403_p11 = scmp.ne.s32.totalorder (!%p141_p9), %s277_s10, %s402_s24  ;;  %s466_s25 = smov (!%p141_p9), [#allocation2]  }
  0x13   : > { %vm203_vm0 = vcmask 1044480   ;;  %v464_v0 = vmov 0   ;;  %v171_v1 = vld [vmem:[%s582_s2] sm:$0xf]  ;;  %s165_s26 = scalar_select %p164_p10, %s508_s16, 1  ;;  %vm204_vm1 = vcmask 1045504  }
  0x14   : > { %245 = vmatprep.mubr.bf16.mxu0 %v464_v0  ;;  %395 = vset.pattern.permute.xlu0 %v464_v0  ;;  %v465_v2 = vmov 65535   ;;  %v170_v11 = vld [vmem:[%s581_s1] sm:$0x3]  ;;  %vm199_vm2 = vcmask 220160   ;;  %p404_p12 = pnand %p403_p11, %p525_p5  ;;  %s406_s16 = sshll.u32 %s466_s25, 4  ;;  %s407_s16 = int_to_ptr.vmem [resolvable:$false] %s406_s16 }
  0x15   : > { %v205_v3 = vsel %vm203_vm0, 4294967295, %v465_v2  ;;  %178 = vperm.xlu0 %395, %v171_v1   ;;  %s352_s27 = sshll.u32 %s165_s26, 5  ;;  %s408_s26 = scalar_lea.vmem %s407_s16, 256 }
  0x16   : > { %s168_s30 = scalar_lea.vmem %s580_s0, %s352_s27  ;;  %v206_v4 = vsel %vm204_vm1, %v205_v3, 0  ;;  %p405_p13 = pneg %p404_p12 }
  0x17   : > { %v396_v5 = vld [vmem:[%s168_s30 + $0x14] ss:$8 sps:$4 sm:$0x3f]   ;;  %v398_v6 = vld [vmem:[%s168_s30 + $0x10] ss:$8 sps:$4 sm:$0x3f]   ;;  %p409_p0 = scmp.lt.s32.totalorder %s277_s10, %s407_s16  ;;  %p410_p1 = scmp.lt.s32.totalorder %s408_s26, %s402_s24 }
  0x18   : > { %v211_v7 = vand.u32 %v396_v5, %v206_v4  ;;  %v399_v8 = vld [vmem:[%s168_s30 + $0x4] ss:$8 sps:$4 sm:$0xff]   ;;  %v208_v9 = vand.u32 %v398_v6, %v206_v4  ;;  %v401_v10 = vld [vmem:[%s168_s30] ss:$8 sps:$4 sm:$0xff]  }
  0x19   : > { %p411_p2 = por %p410_p1, %p409_p0 }
  0x1a   : > { %225 = vmatprep.subr.bf16.mxu0 %v211_v7 }
  0x1b   : > { %226 = vmatpush1.bf16.msra.mxu0 %v208_v9  ;;  %p412_p3 = pnand %p411_p2, %p405_p13 }
  0x1c   : > { %227 = vmatprep.subr.bf16.mxu0 %v399_v8 }
  0x1f   : > { %228 = vmatpush1.bf16.msra.mxu0 %v401_v10 }
  0x22   : > { %346 = vmatmul.mubr.msk.bf16.vlgmr.msra.gmra.mxu0 %vm199_vm2, %v170_v11 }
  0x90   : > { %v179_v12 = vpop.permute.xlu0 %178 }
  0xe2   : > { %v247_v13 = vpop.f32.mrf.mxu0 }
  0xe3   : > { %v248_v14 = vadd.f32 %v247_v13, %v179_v12 }
  0xe4   : > { %v249_v15 = vpop.f32.mrf.mxu0 }
  0xe5   : > { %v250_v16 = vadd.f32 %v249_v15, %v179_v12  ;;  %v254_v18 = vmax.f32 %v248_v14, 0.0 }
  0xe6   : > { %v251_v17 = vpop.f32.mrf.mxu0 }
  0xe7   : > { %v255_v19 = vmax.f32 %v250_v16, 0.0 }
  0xe8   : > { %v252_v20 = vpop.f32.mrf.mxu0 }
  0xe9   : > { %v258_v21 = vcombine.low %v254_v18, %v255_v19 }
  0xeb   : > { %260 = vst [vmem:[%s163_s9] sm:$0xff] %v258_v21 }
  0xec   : > { %415 = shalt.err (!%p412_p3)
}
  0xed   : > { %s416_s27 = scalar_lea.hbm %s274_s19, 128  ;;  %s420_s30 = scalar_lea.hbm %s583_s3, 256 }
  0xee   : > { %p417_p4 = scmp.ne.s32.totalorder %s274_s19, %s416_s27  ;;  %p421_p9 = scmp.lt.s32.totalorder %s274_s19, %s583_s3 }
  0xef   : > { %p422_p10 = scmp.lt.s32.totalorder %s420_s30, %s416_s27 }
  0xf0   : > { %p418_p7 = pnand %p417_p4, %p525_p5 }
  0xf1   : > { %p423_p11 = por %p422_p10, %p421_p9 }
  0xf2   : > { %p419_p8 = pneg %p418_p7 }
  0xf4   : > { %p424_p12 = pnand %p423_p11, %p419_p8 }
  0xf6   : > { %427 = shalt.err (!%p424_p12)
}
  0xf7   : > { %354 = dma.vmem_to_hbm [thread:$0]  (%p525_p5), %s277_s10, 128, %s274_s19, %s262_s20  }
  0xf8 PF: > { %p360_p13 = scmp.ge.s32.totalorder %s462_s15, 2  ;;  %s288_s6 = sand.u32 1, %s450_s12  }
  0xf9   : > { %s289_s7 = scalar_lea.sflag [#allocation3], %s288_s6 }
  0xfa   : > { %p357_p0 = pnand %p360_p13, %p529_p6 }
  0xfc   : > { %p358_p1 = pneg %p357_p0 }
  0xfe   : > { %445 = dma.done.wait (%p358_p1), %s289_s7, 128  }
  0xff   : > { %447 = vsyncadd (%p358_p1), %s289_s7, 4294967168  ;;  %p13_p2 = scmp.ge.s32.totalorder %s512_s18, 4   ;;  %s586_s12 = smov %s454_s13 }
 0x100   : > { %s587_s13 = smov %s458_s14  ;;  %s588_s14 = smov %s523_s21 }
 0x101   : > { %s589_s15 = smov %s512_s18  ;;  %15 = sbr.rel (!%p13_p2) target bundleno = 3 (0x3), region = 67 }
 0x106   :  { %294 = vsyncpa [#allocation3], 1 }
 0x107   :  { %296 = vsyncpa [#allocation3 + $0x1], 1 }

</bundles_post_ra>
